<compile_context>
chip_gen: v6e
topology: v6e:2x2x1
jax: 0.10.0
libtpu: 0.0.40
codegen_flags: <defaults>
</compile_context>

<pallas_src>
import math

import jax
import jax.numpy as jnp
from jax.experimental import pallas as pl
from jax.experimental.pallas import tpu as pltpu
from jax.scipy.linalg import block_diag


# --------------------------------- Pallas kernel -----------------------------------
def _forward_kernel(x_ref, *refs):
    # refs = [M_1, b_1, M_2, b_2, ..., M_6, b_6, out_ref]
    out_ref = refs[-1]
    layer_refs = refs[:-1]
    n_layers = len(layer_refs) // 2

    h = x_ref[...]                                              # (Bt, d_in) f32
    for l in range(n_layers):                                   # statically unrolled
        m = layer_refs[2 * l + 0][...]                          # (d_in_l, d_out_l)
        b = layer_refs[2 * l + 1][...]                          # (1, d_out_l)
        acc = jnp.dot(h, m, preferred_element_type=jnp.float32) + b
        if l < n_layers - 1:
            h = jnp.maximum(acc, 0.0)                           # ReLU
        else:
            h = jax.nn.sigmoid(acc)                             # fused final Sigmoid
    out_ref[...] = h                                            # (Bt, 128) lane-dense


def _round_up(n, m):
    return ((n + m - 1) // m) * m


_TARGET_BT = 256  # multiple of 256 fills v6e/v7x MXU rows; multiple of 128 for v5e.


def forward(params, x):
    # x: (B, C_in, L) in PyTorch NCL layout.
    B, c_in, L = x.shape
    d_in = c_in * L
    # Pure reshape (no transpose): first-layer fused matrix expects channel-major rows.
    x_flat = x.reshape(B, d_in).astype(jnp.float32)

    # Batch block: fill MXU rows at large B, pad tiny B up to one sublane-aligned block.
    # TODO(synk): at huge B on v7x keep >= 2 parallel blocks so both TensorCores work;
    # with Bt=256 that is automatic for B >= 512.
    bt = _TARGET_BT if B >= _TARGET_BT else _round_up(B, 8)
    b_pad = _round_up(B, bt)
    if b_pad != B:
        x_flat = jnp.pad(x_flat, ((0, b_pad - B), (0, 0)))

    inputs = [x_flat]
    in_specs = [pl.BlockSpec((bt, d_in), lambda i: (i, 0))]
    for m, b in params['layers']:
        inputs += [m, b]
        in_specs += [pl.BlockSpec(m.shape, lambda i: (0, 0)),
                     pl.BlockSpec(b.shape, lambda i: (0, 0))]

    d_out = params['d_out']
    out = pl.pallas_call(
        _forward_kernel,
        out_shape=jax.ShapeDtypeStruct((b_pad, d_out), jnp.float32),
        grid=(b_pad // bt,),
        in_specs=in_specs,
        out_specs=pl.BlockSpec((bt, d_out), lambda i: (i, 0)),
        compiler_params=pltpu.CompilerParams(dimension_semantics=("parallel",)),
    )(*inputs)

    # Split the lane-dense slab: channel-major flat layout -> (B, 8, L), no transpose.
    l_out, n_out = params['out_len'], params['n_out']
    out = out[:B].reshape(B, n_out, l_out)
    reconstructed = jnp.squeeze(out[:, 0, :])      # torch .squeeze() of (B,1,L)
    noise = jnp.squeeze(out[:, 1, :])
    confounds = out[:, 2:, :]                      # (B, 6, L)
    return reconstructed, noise, confounds


# ------------------------------ parameter construction ------------------------------
def _uniform(key, shape, bound):
    return jax.random.uniform(key, shape, jnp.float32, minval=-bound, maxval=bound)


def _gather_matrix(l_in, l_out, stride, pad, k):
    # Conv1d: out row t reads x[stride*t + tap - pad] (zero row when out of range).
    t = jnp.arange(l_out)[:, None]
    j = jnp.arange(l_in)[None, :]
    return jnp.stack([(j == stride * t + tap - pad).astype(jnp.float32)
                      for tap in range(k)], axis=0)             # (k, l_out, l_in)


def _scatter_matrix(l_in, l_out, stride, pad, k):
    # ConvTranspose1d: out row j receives x[i] where j == stride*i + tap - pad.
    j = jnp.arange(l_out)[:, None]
    i = jnp.arange(l_in)[None, :]
    return jnp.stack([(j == stride * i + tap - pad).astype(jnp.float32)
                      for tap in range(k)], axis=0)             # (k, l_out, l_in)


def _fuse_layer(spatial, w_taps, bias, in_channel_major, out_channel_major):
    # spatial: (K, L_out, L_in) 0/1 gather/scatter; w_taps: (K, C_in, C_out).
    # Builds the dense matrix M with M[in_flat, out_flat] so that  y_flat = x_flat @ M + b.
    k, l_out, l_in = spatial.shape
    _, c_in, c_out = w_taps.shape
    t = jnp.einsum('kol,kij->lioj', spatial, w_taps,
                   precision=jax.lax.Precision.HIGHEST)         # (L_in, C_in, L_out, C_out)
    in_axes = (1, 0) if in_channel_major else (0, 1)
    out_axes = (3, 2) if out_channel_major else (2, 3)
    m = jnp.transpose(t, in_axes + out_axes).reshape(l_in * c_in, l_out * c_out)
    if bias is None:
        bias = jnp.zeros((c_out,), jnp.float32)
    b_flat = jnp.repeat(bias, l_out) if out_channel_major else jnp.tile(bias, l_out)
    return m.astype(jnp.float32), b_flat.reshape(1, -1).astype(jnp.float32)


def init_params(key, input_channels=1, latent_dim=16, length=16):
    keys = iter(jax.random.split(key, 40))

    def conv_p(c_out, c_in, k=3):
        bound = 1.0 / math.sqrt(c_in * k)
        return (_uniform(next(keys), (c_out, c_in, k), bound),
                _uniform(next(keys), (c_out,), bound))

    def convT_p(c_in, c_out, k=3, bias=True):
        bound = 1.0 / math.sqrt(c_out * k)
        w = _uniform(next(keys), (c_in, c_out, k), bound)
        b = _uniform(next(keys), (c_out,), bound) if bias else None
        return (w, b)

    # ---- raw PyTorch-layout parameters (also used by the pure-JAX reference) ----
    enc = [conv_p(16, input_channels), conv_p(32, 16), conv_p(latent_dim, 32)]
    dec_s = [convT_p(latent_dim, 32), convT_p(32, 16), convT_p(16, 1)]
    dec_n = [convT_p(latent_dim, 32), convT_p(32, 16), convT_p(16, 1)]
    dec_c = [convT_p(latent_dim, 32, bias=False), convT_p(32, 16, bias=False),
             convT_p(16, 6, bias=False)]
    raw = {'encoder': enc, 'dec_signal': dec_s, 'dec_noise': dec_n, 'dec_conf': dec_c}

    # ---- pre-fused dense layer matrices (all layout / fusion work done here) ----
    layers = []
    l_cur = length
    for idx, (w, b) in enumerate(enc):                          # Conv1d k=3 s=2 p=1
        l_out = (l_cur + 2 * 1 - 3) // 2 + 1
        g = _gather_matrix(l_cur, l_out, 2, 1, 3)
        w_taps = jnp.transpose(w, (2, 1, 0))                    # (3, C_in, C_out)
        layers.append(_fuse_layer(g, w_taps, b,
                                  in_channel_major=(idx == 0),  # matches x.reshape(B,C*L)
                                  out_channel_major=False))
        l_cur = l_out

    for i in range(3):                                          # ConvT k=3 s=2 p=1 op=1
        ws, bs = dec_s[i]
        wn, bn = dec_n[i]
        wc, _ = dec_c[i]
        wsT = jnp.transpose(ws, (2, 0, 1))                      # (3, C_in, C_out)
        wnT = jnp.transpose(wn, (2, 0, 1))
        wcT = jnp.transpose(wc, (2, 0, 1))
        if i == 0:
            # shared latent input: concatenate branches along C_out
            w_taps = jnp.concatenate([wsT, wnT, wcT], axis=2)
        else:
            # independent branches: block-diagonal per tap
            w_taps = jnp.stack([block_diag(wsT[t], wnT[t], wcT[t]) for t in range(3)],
                               axis=0)
        b_f = jnp.concatenate([bs, bn, jnp.zeros((wc.shape[1],), jnp.float32)])
        l_out = 2 * l_cur
        s = _scatter_matrix(l_cur, l_out, 2, 1, 3)
        # final layer emits channel-major columns -> (B, 8*L) slab splits with no transpose
        layers.append(_fuse_layer(s, w_taps, b_f,
                                  in_channel_major=False,
                                  out_channel_major=(i == 2)))
        l_cur = l_out

    params = {'layers': layers, 'out_len': l_cur, 'n_out': 8,
              'd_out': layers[-1][0].shape[1]}
    return params, raw


# -------------------- pure-JAX reference (PyTorch semantics check) -------------------
_PREC = jax.lax.Precision.HIGHEST


def _ref_conv1d(x, w, b, stride, pad):
    y = jax.lax.conv_general_dilated(
        x, w, window_strides=(stride,), padding=[(pad, pad)],
        dimension_numbers=('NCH', 'OIH', 'NCH'), precision=_PREC)
    return y + b[None, :, None]


def _ref_convT1d(x, w, b, stride, pad, out_pad):
    k = w.shape[2]
    w_conv = jnp.flip(jnp.transpose(w, (1, 0, 2)), axis=2)
    y = jax.lax.conv_general_dilated(
        x, w_conv, window_strides=(1,),
        padding=[(k - 1 - pad, k - 1 - pad + out_pad)],
        lhs_dilation=(stride,), dimension_numbers=('NCH', 'OIH', 'NCH'),
        precision=_PREC)
    if b is not None:
        y = y + b[None, :, None]
    return y


def reference_forward(raw, x):
    h = x
    for (w, b) in raw['encoder']:
        h = jax.nn.relu(_ref_conv1d(h, w, b, stride=2, pad=1))
    latent = h

    def dec(branch):
        hh = latent
        n = len(branch)
        for i, (w, b) in enumerate(branch):
            hh = _ref_convT1d(hh, w, b, stride=2, pad=1, out_pad=1)
            hh = jax.nn.relu(hh) if i < n - 1 else jax.nn.sigmoid(hh)
        return hh

    return (jnp.squeeze(dec(raw['dec_signal'])),
            jnp.squeeze(dec(raw['dec_noise'])),
            dec(raw['dec_conf']))


# --------------------------------------- main ---------------------------------------
if __name__ == "__main__":
    key = jax.random.PRNGKey(0)
    kp, kx = jax.random.split(key)
    B, C_in, L = 2, 1, 16
    params, raw = init_params(kp, input_channels=C_in, latent_dim=16, length=L)
    x = jax.random.normal(kx, (B, C_in, L), jnp.float32)

    fwd = jax.jit(lambda xx: forward(params, xx))
    reconstructed, noise, confounds = fwd(x)
    reconstructed = jax.block_until_ready(reconstructed)
    noise = jax.block_until_ready(noise)
    confounds = jax.block_until_ready(confounds)

    assert reconstructed.shape == (B, L)
    assert noise.shape == (B, L)
    assert confounds.shape == (B, 6, L)

    # correctness vs. a pure-JAX/XLA reference of the PyTorch module
    ref_rec, ref_noi, ref_con = reference_forward(raw, x)
    assert bool(jnp.allclose(reconstructed, ref_rec, atol=5e-3, rtol=5e-3))
    assert bool(jnp.allclose(noise, ref_noi, atol=5e-3, rtol=5e-3))
    assert bool(jnp.allclose(confounds, ref_con, atol=5e-3, rtol=5e-3))

    print("KERNEL_OK")
</pallas_src>

<mosaic_0001>
module attributes {stable_mosaic.version = 11 : i64} {
  func.func @_forward_kernel(%arg0: i32, %arg1: memref<8x16xf32, #tpu.memory_space<vmem>>, %arg2: memref<16x128xf32, #tpu.memory_space<vmem>>, %arg3: memref<1x128xf32, #tpu.memory_space<vmem>>, %arg4: memref<128x128xf32, #tpu.memory_space<vmem>>, %arg5: memref<1x128xf32, #tpu.memory_space<vmem>>, %arg6: memref<128x32xf32, #tpu.memory_space<vmem>>, %arg7: memref<1x32xf32, #tpu.memory_space<vmem>>, %arg8: memref<32x384xf32, #tpu.memory_space<vmem>>, %arg9: memref<1x384xf32, #tpu.memory_space<vmem>>, %arg10: memref<384x384xf32, #tpu.memory_space<vmem>>, %arg11: memref<1x384xf32, #tpu.memory_space<vmem>>, %arg12: memref<384x128xf32, #tpu.memory_space<vmem>>, %arg13: memref<1x128xf32, #tpu.memory_space<vmem>>, %arg14: memref<8x128xf32, #tpu.memory_space<vmem>>) attributes {dimension_semantics = [#tpu.dimension_semantics<parallel>], iteration_bounds = array<i64: 1>, scalar_prefetch = 0 : i64, scratch_operands = 0 : i64, tpu.core_type = #tpu.core_type<tc>, window_params = [{transform_indices = @transform_0, window_bounds = array<i64: 8, 16>}, {pipeline_mode = #tpu.pipeline_mode<synchronous>, transform_indices = @transform_1, window_bounds = array<i64: 16, 128>}, {pipeline_mode = #tpu.pipeline_mode<synchronous>, transform_indices = @transform_2, window_bounds = array<i64: 1, 128>}, {pipeline_mode = #tpu.pipeline_mode<synchronous>, transform_indices = @transform_3, window_bounds = array<i64: 128, 128>}, {pipeline_mode = #tpu.pipeline_mode<synchronous>, transform_indices = @transform_4, window_bounds = array<i64: 1, 128>}, {pipeline_mode = #tpu.pipeline_mode<synchronous>, transform_indices = @transform_5, window_bounds = array<i64: 128, 32>}, {pipeline_mode = #tpu.pipeline_mode<synchronous>, transform_indices = @transform_6, window_bounds = array<i64: 1, 32>}, {pipeline_mode = #tpu.pipeline_mode<synchronous>, transform_indices = @transform_7, window_bounds = array<i64: 32, 384>}, {pipeline_mode = #tpu.pipeline_mode<synchronous>, transform_indices = @transform_8, window_bounds = array<i64: 1, 384>}, {pipeline_mode = #tpu.pipeline_mode<synchronous>, transform_indices = @transform_9, window_bounds = array<i64: 384, 384>}, {pipeline_mode = #tpu.pipeline_mode<synchronous>, transform_indices = @transform_10, window_bounds = array<i64: 1, 384>}, {pipeline_mode = #tpu.pipeline_mode<synchronous>, transform_indices = @transform_11, window_bounds = array<i64: 384, 128>}, {pipeline_mode = #tpu.pipeline_mode<synchronous>, transform_indices = @transform_12, window_bounds = array<i64: 1, 128>}, {transform_indices = @transform_13, window_bounds = array<i64: 8, 128>}]} {
    %c0 = arith.constant 0 : index
    %c0_0 = arith.constant 0 : index
    %0 = vector.load %arg1[%c0, %c0_0] : memref<8x16xf32, #tpu.memory_space<vmem>>, vector<8x16xf32>
    %c0_1 = arith.constant 0 : index
    %c0_2 = arith.constant 0 : index
    %1 = vector.load %arg2[%c0_1, %c0_2] : memref<16x128xf32, #tpu.memory_space<vmem>>, vector<16x128xf32>
    %c0_3 = arith.constant 0 : index
    %c0_4 = arith.constant 0 : index
    %2 = vector.load %arg3[%c0_3, %c0_4] : memref<1x128xf32, #tpu.memory_space<vmem>>, vector<1x128xf32>
    %cst = arith.constant dense<0.000000e+00> : vector<8x128xf32>
    %3 = tpu.matmul %0, %1, %cst {dimension_numbers = #tpu.dot_dimension_numbers<[1], [0], [0], [1], [0, 0, 1, 1], [], []>} : vector<8x16xf32>, vector<16x128xf32>, vector<8x128xf32> -> vector<8x128xf32>
    %4 = vector.broadcast %2 : vector<1x128xf32> to vector<8x128xf32>
    %5 = arith.addf %3, %4 : vector<8x128xf32>
    %cst_5 = arith.constant 0.000000e+00 : f32
    %6 = vector.broadcast %cst_5 : f32 to vector<8x128xf32>
    %7 = arith.maximumf %5, %6 : vector<8x128xf32>
    %c0_6 = arith.constant 0 : index
    %c0_7 = arith.constant 0 : index
    %8 = vector.load %arg4[%c0_6, %c0_7] : memref<128x128xf32, #tpu.memory_space<vmem>>, vector<128x128xf32>
    %c0_8 = arith.constant 0 : index
    %c0_9 = arith.constant 0 : index
    %9 = vector.load %arg5[%c0_8, %c0_9] : memref<1x128xf32, #tpu.memory_space<vmem>>, vector<1x128xf32>
    %cst_10 = arith.constant dense<0.000000e+00> : vector<8x128xf32>
    %10 = tpu.matmul %7, %8, %cst_10 {dimension_numbers = #tpu.dot_dimension_numbers<[1], [0], [0], [1], [0, 0, 1, 1], [], []>} : vector<8x128xf32>, vector<128x128xf32>, vector<8x128xf32> -> vector<8x128xf32>
    %11 = vector.broadcast %9 : vector<1x128xf32> to vector<8x128xf32>
    %12 = arith.addf %10, %11 : vector<8x128xf32>
    %cst_11 = arith.constant 0.000000e+00 : f32
    %13 = vector.broadcast %cst_11 : f32 to vector<8x128xf32>
    %14 = arith.maximumf %12, %13 : vector<8x128xf32>
    %c0_12 = arith.constant 0 : index
    %c0_13 = arith.constant 0 : index
    %15 = vector.load %arg6[%c0_12, %c0_13] : memref<128x32xf32, #tpu.memory_space<vmem>>, vector<128x32xf32>
    %c0_14 = arith.constant 0 : index
    %c0_15 = arith.constant 0 : index
    %16 = vector.load %arg7[%c0_14, %c0_15] : memref<1x32xf32, #tpu.memory_space<vmem>>, vector<1x32xf32>
    %cst_16 = arith.constant dense<0.000000e+00> : vector<8x32xf32>
    %17 = tpu.matmul %14, %15, %cst_16 {dimension_numbers = #tpu.dot_dimension_numbers<[1], [0], [0], [1], [0, 0, 1, 1], [], []>} : vector<8x128xf32>, vector<128x32xf32>, vector<8x32xf32> -> vector<8x32xf32>
    %18 = vector.broadcast %16 : vector<1x32xf32> to vector<8x32xf32>
    %19 = arith.addf %17, %18 : vector<8x32xf32>
    %cst_17 = arith.constant 0.000000e+00 : f32
    %20 = vector.broadcast %cst_17 : f32 to vector<8x32xf32>
    %21 = arith.maximumf %19, %20 : vector<8x32xf32>
    %c0_18 = arith.constant 0 : index
    %c0_19 = arith.constant 0 : index
    %22 = vector.load %arg8[%c0_18, %c0_19] : memref<32x384xf32, #tpu.memory_space<vmem>>, vector<32x384xf32>
    %c0_20 = arith.constant 0 : index
    %c0_21 = arith.constant 0 : index
    %23 = vector.load %arg9[%c0_20, %c0_21] : memref<1x384xf32, #tpu.memory_space<vmem>>, vector<1x384xf32>
    %cst_22 = arith.constant dense<0.000000e+00> : vector<8x384xf32>
    %24 = tpu.matmul %21, %22, %cst_22 {dimension_numbers = #tpu.dot_dimension_numbers<[1], [0], [0], [1], [0, 0, 1, 1], [], []>} : vector<8x32xf32>, vector<32x384xf32>, vector<8x384xf32> -> vector<8x384xf32>
    %25 = vector.broadcast %23 : vector<1x384xf32> to vector<8x384xf32>
    %26 = arith.addf %24, %25 : vector<8x384xf32>
    %cst_23 = arith.constant 0.000000e+00 : f32
    %27 = vector.broadcast %cst_23 : f32 to vector<8x384xf32>
    %28 = arith.maximumf %26, %27 : vector<8x384xf32>
    %c0_24 = arith.constant 0 : index
    %c0_25 = arith.constant 0 : index
    %29 = vector.load %arg10[%c0_24, %c0_25] : memref<384x384xf32, #tpu.memory_space<vmem>>, vector<384x384xf32>
    %c0_26 = arith.constant 0 : index
    %c0_27 = arith.constant 0 : index
    %30 = vector.load %arg11[%c0_26, %c0_27] : memref<1x384xf32, #tpu.memory_space<vmem>>, vector<1x384xf32>
    %cst_28 = arith.constant dense<0.000000e+00> : vector<8x384xf32>
    %31 = tpu.matmul %28, %29, %cst_28 {dimension_numbers = #tpu.dot_dimension_numbers<[1], [0], [0], [1], [0, 0, 1, 1], [], []>} : vector<8x384xf32>, vector<384x384xf32>, vector<8x384xf32> -> vector<8x384xf32>
    %32 = vector.broadcast %30 : vector<1x384xf32> to vector<8x384xf32>
    %33 = arith.addf %31, %32 : vector<8x384xf32>
    %cst_29 = arith.constant 0.000000e+00 : f32
    %34 = vector.broadcast %cst_29 : f32 to vector<8x384xf32>
    %35 = arith.maximumf %33, %34 : vector<8x384xf32>
    %c0_30 = arith.constant 0 : index
    %c0_31 = arith.constant 0 : index
    %36 = vector.load %arg12[%c0_30, %c0_31] : memref<384x128xf32, #tpu.memory_space<vmem>>, vector<384x128xf32>
    %c0_32 = arith.constant 0 : index
    %c0_33 = arith.constant 0 : index
    %37 = vector.load %arg13[%c0_32, %c0_33] : memref<1x128xf32, #tpu.memory_space<vmem>>, vector<1x128xf32>
    %cst_34 = arith.constant dense<0.000000e+00> : vector<8x128xf32>
    %38 = tpu.matmul %35, %36, %cst_34 {dimension_numbers = #tpu.dot_dimension_numbers<[1], [0], [0], [1], [0, 0, 1, 1], [], []>} : vector<8x384xf32>, vector<384x128xf32>, vector<8x128xf32> -> vector<8x128xf32>
    %39 = vector.broadcast %37 : vector<1x128xf32> to vector<8x128xf32>
    %40 = arith.addf %38, %39 : vector<8x128xf32>
    %41 = arith.negf %40 : vector<8x128xf32>
    %42 = math.exp %41 : vector<8x128xf32>
    %cst_35 = arith.constant 1.000000e+00 : f32
    %43 = vector.broadcast %cst_35 : f32 to vector<8x128xf32>
    %44 = arith.addf %43, %42 : vector<8x128xf32>
    %45 = arith.divf %43, %44 : vector<8x128xf32>
    %c0_36 = arith.constant 0 : index
    %c0_37 = arith.constant 0 : index
    %46 = vector.load %arg14[%c0_36, %c0_37] : memref<8x128xf32, #tpu.memory_space<vmem>>, vector<8x128xf32>
    tpu.vector_store %arg14[%c0_36, %c0_37], %45 {strides = array<i32>} : memref<8x128xf32, #tpu.memory_space<vmem>>, vector<8x128xf32>,
    return
  }
  func.func @transform_0(%arg0: i32) -> (i32, i32) {
    %c0_i32 = arith.constant 0 : i32
    %c0_i32_0 = arith.constant 0 : i32
    return %arg0, %c0_i32 : i32, i32
  }
  func.func @transform_1(%arg0: i32) -> (i32, i32) {
    %c0_i32 = arith.constant 0 : i32
    %c0_i32_0 = arith.constant 0 : i32
    %c0_i32_1 = arith.constant 0 : i32
    return %c0_i32, %c0_i32_0 : i32, i32
  }
  func.func @transform_2(%arg0: i32) -> (i32, i32) {
    %c0_i32 = arith.constant 0 : i32
    %c0_i32_0 = arith.constant 0 : i32
    %c0_i32_1 = arith.constant 0 : i32
    return %c0_i32, %c0_i32_0 : i32, i32
  }
  func.func @transform_3(%arg0: i32) -> (i32, i32) {
    %c0_i32 = arith.constant 0 : i32
    %c0_i32_0 = arith.constant 0 : i32
    %c0_i32_1 = arith.constant 0 : i32
    return %c0_i32, %c0_i32_0 : i32, i32
  }
  func.func @transform_4(%arg0: i32) -> (i32, i32) {
    %c0_i32 = arith.constant 0 : i32
    %c0_i32_0 = arith.constant 0 : i32
    %c0_i32_1 = arith.constant 0 : i32
    return %c0_i32, %c0_i32_0 : i32, i32
  }
  func.func @transform_5(%arg0: i32) -> (i32, i32) {
    %c0_i32 = arith.constant 0 : i32
    %c0_i32_0 = arith.constant 0 : i32
    %c0_i32_1 = arith.constant 0 : i32
    return %c0_i32, %c0_i32_0 : i32, i32
  }
  func.func @transform_6(%arg0: i32) -> (i32, i32) {
    %c0_i32 = arith.constant 0 : i32
    %c0_i32_0 = arith.constant 0 : i32
    %c0_i32_1 = arith.constant 0 : i32
    return %c0_i32, %c0_i32_0 : i32, i32
  }
  func.func @transform_7(%arg0: i32) -> (i32, i32) {
    %c0_i32 = arith.constant 0 : i32
    %c0_i32_0 = arith.constant 0 : i32
    %c0_i32_1 = arith.constant 0 : i32
    return %c0_i32, %c0_i32_0 : i32, i32
  }
  func.func @transform_8(%arg0: i32) -> (i32, i32) {
    %c0_i32 = arith.constant 0 : i32
    %c0_i32_0 = arith.constant 0 : i32
    %c0_i32_1 = arith.constant 0 : i32
    return %c0_i32, %c0_i32_0 : i32, i32
  }
  func.func @transform_9(%arg0: i32) -> (i32, i32) {
    %c0_i32 = arith.constant 0 : i32
    %c0_i32_0 = arith.constant 0 : i32
    %c0_i32_1 = arith.constant 0 : i32
    return %c0_i32, %c0_i32_0 : i32, i32
  }
  func.func @transform_10(%arg0: i32) -> (i32, i32) {
    %c0_i32 = arith.constant 0 : i32
    %c0_i32_0 = arith.constant 0 : i32
    %c0_i32_1 = arith.constant 0 : i32
    return %c0_i32, %c0_i32_0 : i32, i32
  }
  func.func @transform_11(%arg0: i32) -> (i32, i32) {
    %c0_i32 = arith.constant 0 : i32
    %c0_i32_0 = arith.constant 0 : i32
    %c0_i32_1 = arith.constant 0 : i32
    return %c0_i32, %c0_i32_0 : i32, i32
  }
  func.func @transform_12(%arg0: i32) -> (i32, i32) {
    %c0_i32 = arith.constant 0 : i32
    %c0_i32_0 = arith.constant 0 : i32
    %c0_i32_1 = arith.constant 0 : i32
    return %c0_i32, %c0_i32_0 : i32, i32
  }
  func.func @transform_13(%arg0: i32) -> (i32, i32) {
    %c0_i32 = arith.constant 0 : i32
    %c0_i32_0 = arith.constant 0 : i32
    return %arg0, %c0_i32 : i32, i32
  }
}

</mosaic_0001>

<bundles_post_ra>
// kernel: _lambda_.1
= control target key start
LH: loop header
LB: loop body
LE: loop exit
PB: predicated region body
PF: predicated region fallthrough
CT: control target
= control target key end

     0   :  { %18 = vsyncpa [#allocation3], 0  ;;  %s1902_s0 = inlined_call_operand.vmem [shape: f32[8,16], index: 0, kind: input, shape index: {}]   ;;  %s1903_s1 = inlined_call_operand.vmem [shape: f32[16,128], index: 1, kind: input, shape index: {}]   ;;  %s1904_s2 = inlined_call_operand.vmem [shape: f32[1,128], index: 2, kind: input, shape index: {}]   ;;  %s1905_s3 = inlined_call_operand.hbm [shape: f32[128,128], index: 3, kind: input, shape index: {}]   ;;  %s1906_s4 = inlined_call_operand.vmem [shape: f32[1,128], index: 4, kind: input, shape index: {}]   ;;  %s1907_s5 = inlined_call_operand.hbm [shape: f32[128,32], index: 5, kind: input, shape index: {}]   ;;  %s1908_s6 = inlined_call_operand.vmem [shape: f32[1,32], index: 6, kind: input, shape index: {}]   ;;  %s1909_s7 = inlined_call_operand.hbm [shape: f32[32,384], index: 7, kind: input, shape index: {}]   ;;  %s1910_s8 = inlined_call_operand.vmem [shape: f32[1,384], index: 8, kind: input, shape index: {}]   ;;  %s1911_s9 = inlined_call_operand.hbm [shape: f32[384,384], index: 9, kind: input, shape index: {}]   ;;  %s1912_s10 = inlined_call_operand.vmem [shape: f32[1,384], index: 10, kind: input, shape index: {}]   ;;  %s1913_s11 = inlined_call_operand.hbm [shape: f32[384,128], index: 11, kind: input, shape index: {}]   ;;  %s1914_s12 = inlined_call_operand.vmem [shape: f32[1,128], index: 12, kind: input, shape index: {}]   ;;  %s1915_s13 = inlined_call_operand.vmem [shape: f32[8,128], index: 13, kind: output, shape index: {}]  }
   0x1   :  { %19 = vsyncpa [#allocation5], 0 }
   0x2   :  { %20 = vsyncpa [#allocation8], 0  ;;  %s1650_s25 = smov [#allocation4]  }
   0x3   :  { %s46_s26 = sshll.u32 %s1650_s25, 4  ;;  %s47_s26 = int_to_ptr.vmem [resolvable:$true] %s46_s26 }
   0x4   :  { %s1552_s27 = scalar_lea.vmem %s47_s26, 2048  ;;  %p1557_p1 = scmp.lt.s32.totalorder %s47_s26, %s47_s26 }
   0x5   :  { %p1553_p0 = scmp.ne.s32.totalorder %s47_s26, %s1552_s27  ;;  %p1558_p2 = scmp.lt.s32.totalorder %s1552_s27, %s1552_s27 }
   0x7   :  { %p1559_p3 = por %p1558_p2, %p1557_p1 }
   0x9   :  { %p1560_p4 = pnand %p1559_p3, %p1553_p0 }
   0xb   :  { %1563 = shalt.err (!%p1560_p4)
}
   0xc   :  { %s1651_s28 = smov 128   ;;  %s1652_s29 = smov 8  }
   0xd   :  { %52 = dma.hbm_to_vmem [thread:$0]  %s1907_s5, 2048, %s47_s26, [#allocation5], %s1651_s28, %s1651_s28, %s1652_s29  }
   0xe   :  { %s1653_s15 = smov [#allocation7]   ;;  %s1654_s17 = smov [#allocation2]  }
   0xf   :  { %s74_s16 = sshll.u32 %s1653_s15, 4  ;;  %s32_s18 = sshll.u32 %s1654_s17, 4  ;;  %s75_s16 = int_to_ptr.vmem [resolvable:$true] %s74_s16  ;;  %s33_s18 = int_to_ptr.vmem [resolvable:$true] %s32_s18 }
  0x10   :  { %s1572_s19 = scalar_lea.vmem %s75_s16, 18432  ;;  %p1577_p6 = scmp.lt.s32.totalorder %s75_s16, %s75_s16 }
  0x11   :  { %p1573_p5 = scmp.ne.s32.totalorder %s75_s16, %s1572_s19  ;;  %p1578_p7 = scmp.lt.s32.totalorder %s1572_s19, %s1572_s19 }
  0x13   :  { %p1579_p8 = por %p1578_p7, %p1577_p6 }
  0x15   :  { %p1580_p9 = pnand %p1579_p8, %p1573_p5 }
  0x17   :  { %1583 = shalt.err (!%p1580_p9)
}
  0x18   :  { %s1655_s20 = smov 384   ;;  %s1656_s21 = smov 24  }
  0x19   :  { %80 = dma.hbm_to_vmem [thread:$0]  %s1911_s9, 18432, %s75_s16, [#allocation8], %s1655_s20, %s1655_s20, %s1656_s21  }
  0x1a   :  { %s1592_s5 = scalar_lea.vmem %s33_s18, 2048  ;;  %p1597_p11 = scmp.lt.s32.totalorder %s33_s18, %s33_s18 }
  0x1b   :  { %p1593_p10 = scmp.ne.s32.totalorder %s33_s18, %s1592_s5  ;;  %p1598_p12 = scmp.lt.s32.totalorder %s1592_s5, %s1592_s5 }
  0x1d   :  { %p1599_p13 = por %p1598_p12, %p1597_p11 }
  0x1f   :  { %p1600_p0 = pnand %p1599_p13, %p1593_p10 }
  0x21   :  { %1603 = shalt.err (!%p1600_p0)
}
  0x22   :  { %38 = dma.hbm_to_vmem [thread:$0]  %s1905_s3, 2048, %s33_s18, [#allocation3], %s1651_s28, %s1651_s28, %s1652_s29  }
  0x23   :  { %s1657_s26 = smov [#allocation6]   ;;  %s1658_s30 = smov [#allocation9]  }
  0x24   :  { %s60_s27 = sshll.u32 %s1657_s26, 4  ;;  %s88_s9 = sshll.u32 %s1658_s30, 4  ;;  %s61_s27 = int_to_ptr.vmem [resolvable:$true] %s60_s27  ;;  %s89_s9 = int_to_ptr.vmem [resolvable:$true] %s88_s9 }
  0x25   :  { %s1612_s14 = scalar_lea.vmem %s61_s27, 1536  ;;  %p1617_p2 = scmp.lt.s32.totalorder %s61_s27, %s61_s27 }
  0x26   :  { %p1613_p1 = scmp.ne.s32.totalorder %s61_s27, %s1612_s14  ;;  %p1618_p3 = scmp.lt.s32.totalorder %s1612_s14, %s1612_s14 }
  0x28   :  { %p1619_p4 = por %p1618_p3, %p1617_p2 }
  0x2a   :  { %p1620_p5 = pnand %p1619_p4, %p1613_p1 }
  0x2c   :  { %1623 = shalt.err (!%p1620_p5)
}
  0x2d   :  { %66 = dma.hbm_to_vmem [thread:$0]  %s1909_s7, 1536, %s61_s27, [#allocation5], %s1655_s20, %s1655_s20, %s1656_s21  }
  0x2e   :  { %s1632_s17 = scalar_lea.vmem %s89_s9, 6144  ;;  %p1637_p7 = scmp.lt.s32.totalorder %s89_s9, %s89_s9 }
  0x2f   :  { %p1633_p6 = scmp.ne.s32.totalorder %s89_s9, %s1632_s17  ;;  %p1638_p8 = scmp.lt.s32.totalorder %s1632_s17, %s1632_s17 }
  0x31   :  { %p1639_p9 = por %p1638_p8, %p1637_p7 }
  0x33   :  { %p1640_p10 = pnand %p1639_p9, %p1633_p6 }
  0x35   :  { %1643 = shalt.err (!%p1640_p10)
}
  0x36   :  { %94 = dma.hbm_to_vmem [thread:$0]  %s1913_s11, 6144, %s89_s9, [#allocation8], %s1651_s28, %s1651_s28, %s1652_s29  }
  0x37   :  { %1644 = dma.done.wait [#allocation3], 2048  }
  0x38   :  { %1645 = vsyncadd [#allocation3], 4294965248 }
  0x39   :  { %1646 = dma.done.wait [#allocation5], 3584  }
  0x3a   :  { %1647 = vsyncadd [#allocation5], 4294963712 }
  0x3b   :  { %1648 = dma.done.wait [#allocation8], 24576  }
  0x3c   :  { %1649 = vsyncadd [#allocation8], 4294942720  ;;  %v1659_v0 = vmov 0.0   ;;  %vm1660_vm0 = vmmov 0   ;;  %v114_v1 = vld [vmem:[%s1903_s1 + $0x8] sm:$0xff]  ;;  %v113_v2 = vld [vmem:[%s1903_s1] sm:$0xff] }
  0x3d   :  { %1371 = vmatprep.subr.mxu0 %v1659_v0  ;;  %1375 = vmatprep.mubr.msk.f32.mxu0 %vm1660_vm0, %v1659_v0  ;;  %v112_v3 = vld [vmem:[%s1902_s0] sm:$0xff]  ;;  %vm122_vm1 = vcmask 130048   ;;  %v212_v4 = vld [vmem:[#allocation2 + $0x78] sm:$0xff]  ;;  %v211_v5 = vld [vmem:[#allocation2 + $0x70] sm:$0xff]  ;;  %vm414_vm2 = vcmask 261120  }
  0x3e   :  { %1378 = vmatprep.subr.mxu1 %v1659_v0  ;;  %1410 = vmatprep.mubr.msk.f32.mxu1 %vm1660_vm0, %v1659_v0  ;;  %v210_v6 = vld [vmem:[#allocation2 + $0x68] sm:$0xff]  ;;  %v209_v7 = vld [vmem:[#allocation2 + $0x60] sm:$0xff]  ;;  %v208_v8 = vld [vmem:[#allocation2 + $0x58] sm:$0xff] }
  0x3f   :  { %1372 = vmatpush3.msra.mxu0 %v114_v1  ;;  %1379 = vmatpush3.msra.mxu1 %v212_v4  ;;  %v207_v9 = vld [vmem:[#allocation2 + $0x50] sm:$0xff]  ;;  %v206_v10 = vld [vmem:[#allocation2 + $0x48] sm:$0xff]  ;;  %v205_v11 = vld [vmem:[#allocation2 + $0x40] sm:$0xff] }
  0x40   :  { %1373 = vmatprep.subr.mxu0 %v1659_v0  ;;  %1380 = vmatprep.subr.mxu1 %v1659_v0  ;;  %v204_v12 = vld [vmem:[#allocation2 + $0x38] sm:$0xff]  ;;  %v203_v13 = vld [vmem:[#allocation2 + $0x30] sm:$0xff]  ;;  %v202_v14 = vld [vmem:[#allocation2 + $0x28] sm:$0xff] }
  0x41   :  { %1374 = vmatpush3.msra.mxu0 %v113_v2  ;;  %1381 = vmatpush3.msra.mxu1 %v211_v5  ;;  %v201_v15 = vld [vmem:[#allocation2 + $0x20] sm:$0xff]  ;;  %v200_v16 = vld [vmem:[#allocation2 + $0x18] sm:$0xff]  ;;  %v199_v17 = vld [vmem:[#allocation2 + $0x10] sm:$0xff] }
  0x42   :  { %1376 = vmatmul.mubr.msk.f32.vlgmr.msra.gmra.mxu0 %vm122_vm1, %v112_v3  ;;  %1382 = vmatprep.subr.mxu1 %v1659_v0  ;;  %v198_v18 = vld [vmem:[#allocation2 + $0x8] sm:$0xff]  ;;  %v197_v19 = vld [vmem:[#allocation2] sm:$0xff]  ;;  %v306_v20 = vld [vmem:[#allocation4 + $0x78] sm:$0xff] }
  0x43   :  { %1413 = vmatprep.subr.mxu0 %v1659_v0  ;;  %1383 = vmatpush3.msra.mxu1 %v210_v6  ;;  %v305_v21 = vld [vmem:[#allocation4 + $0x70] sm:$0xff]  ;;  %v304_v22 = vld [vmem:[#allocation4 + $0x68] sm:$0xff]  ;;  %v303_v23 = vld [vmem:[#allocation4 + $0x60] sm:$0xff] }
  0x44   :  { %1445 = vmatprep.mubr.msk.f32.mxu0 %vm1660_vm0, %v1659_v0  ;;  %1384 = vmatprep.subr.mxu1 %v1659_v0  ;;  %v302_v24 = vld [vmem:[#allocation4 + $0x58] sm:$0xff]  ;;  %v301_v25 = vld [vmem:[#allocation4 + $0x50] sm:$0xff]  ;;  %v300_v26 = vld [vmem:[#allocation4 + $0x48] sm:$0xff] }
  0x45   :  { %1385 = vmatpush3.msra.mxu1 %v209_v7  ;;  %1414 = vmatpush3.msra.mxu0 %v306_v20  ;;  %v299_v27 = vld [vmem:[#allocation4 + $0x40] sm:$0xff]  ;;  %v298_v28 = vld [vmem:[#allocation4 + $0x38] sm:$0xff]  ;;  %v297_v29 = vld [vmem:[#allocation4 + $0x30] sm:$0xff] }
  0x46   :  { %1386 = vmatprep.subr.mxu1 %v1659_v0  ;;  %1415 = vmatprep.subr.mxu0 %v1659_v0  ;;  %v296_v30 = vld [vmem:[#allocation4 + $0x28] sm:$0xff]  ;;  %v295_v31 = vld [vmem:[#allocation4 + $0x20] sm:$0xff]  ;;  %v294_v32 = vld [vmem:[#allocation4 + $0x18] sm:$0xff] }
  0x47   :  { %1387 = vmatpush3.msra.mxu1 %v208_v8  ;;  %1416 = vmatpush3.msra.mxu0 %v305_v21  ;;  %v1217_v33 = vld [vmem:[%s1904_s2] ss:$0 sm:$0xff]  ;;  %v293_v38 = vld [vmem:[#allocation4 + $0x10] sm:$0xff]  ;;  %v292_v39 = vld [vmem:[#allocation4 + $0x8] sm:$0xff] }
  0x48   :  { %1388 = vmatprep.subr.mxu1 %v1659_v0  ;;  %1417 = vmatprep.subr.mxu0 %v1659_v0  ;;  %v291_v40 = vld [vmem:[#allocation4] sm:$0xff]  ;;  %v395_v41 = vld [vmem:[#allocation6 + $0x50] sm:$0xff]  ;;  %v394_v47 = vld [vmem:[#allocation6 + $0x48] sm:$0xff] }
  0x49   :  { %1389 = vmatpush3.msra.mxu1 %v207_v9  ;;  %1418 = vmatpush3.msra.mxu0 %v304_v22  ;;  %v1219_v42 = vld [vmem:[%s1906_s4] ss:$0 sm:$0xff]  ;;  %v392_v48 = vld [vmem:[#allocation6 + $0x38] sm:$0xff]  ;;  %v391_v49 = vld [vmem:[#allocation6 + $0x30] sm:$0xff] }
  0x4a   :  { %1390 = vmatprep.subr.mxu1 %v1659_v0  ;;  %1419 = vmatprep.subr.mxu0 %v1659_v0  ;;  %v389_v50 = vld [vmem:[#allocation6 + $0x20] sm:$0xff]  ;;  %v388_v51 = vld [vmem:[#allocation6 + $0x18] sm:$0xff]  ;;  %v386_v52 = vld [vmem:[#allocation6 + $0x8] sm:$0xff] }
  0x4b   :  { %1391 = vmatpush3.msra.mxu1 %v206_v10  ;;  %1420 = vmatpush3.msra.mxu0 %v303_v23  ;;  %v385_v53 = vld [vmem:[#allocation6] sm:$0xff]  ;;  %v608_v54 = vld [vmem:[#allocation7 + $0x170] sm:$0xff]  ;;  %v607_v55 = vld [vmem:[#allocation7 + $0x168] sm:$0xff] }
  0x4c   :  { %1392 = vmatprep.subr.mxu1 %v1659_v0  ;;  %1421 = vmatprep.subr.mxu0 %v1659_v0  ;;  %v605_v56 = vld [vmem:[#allocation7 + $0x158] sm:$0xff]  ;;  %v604_v57 = vld [vmem:[#allocation7 + $0x150] sm:$0xff]  ;;  %v602_v58 = vld [vmem:[#allocation7 + $0x140] sm:$0xff] }
  0x4d   :  { %1393 = vmatpush3.msra.mxu1 %v205_v11  ;;  %1422 = vmatpush3.msra.mxu0 %v302_v24  ;;  %v601_v59 = vld [vmem:[#allocation7 + $0x138] sm:$0xff]  ;;  %v599_v60 = vld [vmem:[#allocation7 + $0x128] sm:$0xff]  ;;  %v598_v61 = vld [vmem:[#allocation7 + $0x120] sm:$0xff] }
  0x4e   :  { %1394 = vmatprep.subr.mxu1 %v1659_v0  ;;  %1423 = vmatprep.subr.mxu0 %v1659_v0  ;;  %v596_v62 = vld [vmem:[#allocation7 + $0x110] sm:$0xff]  ;;  %v595_v63 = vld [vmem:[#allocation7 + $0x108] sm:$0xff]  ;;  %v593_v1 = vld [vmem:[#allocation7 + $0xf8] sm:$0xff] }
  0x4f   :  { %1395 = vmatpush3.msra.mxu1 %v204_v12  ;;  %1424 = vmatpush3.msra.mxu0 %v301_v25  ;;  %v592_v2 = vld [vmem:[#allocation7 + $0xf0] sm:$0xff]  ;;  %v590_v3 = vld [vmem:[#allocation7 + $0xe0] sm:$0xff]  ;;  %v589_v4 = vld [vmem:[#allocation7 + $0xd8] sm:$0xff] }
  0x50   :  { %1396 = vmatprep.subr.mxu1 %v1659_v0  ;;  %1425 = vmatprep.subr.mxu0 %v1659_v0  ;;  %v587_v5 = vld [vmem:[#allocation7 + $0xc8] sm:$0xff]  ;;  %v586_v6 = vld [vmem:[#allocation7 + $0xc0] sm:$0xff]  ;;  %v584_v7 = vld [vmem:[#allocation7 + $0xb0] sm:$0xff] }
  0x51   :  { %1397 = vmatpush3.msra.mxu1 %v203_v13  ;;  %1426 = vmatpush3.msra.mxu0 %v300_v26  ;;  %v583_v8 = vld [vmem:[#allocation7 + $0xa8] sm:$0xff]  ;;  %v581_v9 = vld [vmem:[#allocation7 + $0x98] sm:$0xff]  ;;  %v580_v10 = vld [vmem:[#allocation7 + $0x90] sm:$0xff] }
  0x52   :  { %1398 = vmatprep.subr.mxu1 %v1659_v0  ;;  %1427 = vmatprep.subr.mxu0 %v1659_v0  ;;  %v578_v11 = vld [vmem:[#allocation7 + $0x80] sm:$0xff]  ;;  %v577_v12 = vld [vmem:[#allocation7 + $0x78] sm:$0xff]  ;;  %v575_v13 = vld [vmem:[#allocation7 + $0x68] sm:$0xff] }
  0x53   :  { %1399 = vmatpush3.msra.mxu1 %v202_v14  ;;  %1428 = vmatpush3.msra.mxu0 %v299_v27  ;;  %v574_v14 = vld [vmem:[#allocation7 + $0x60] sm:$0xff]  ;;  %v565_v20 = vld [vmem:[#allocation7 + $0x18] sm:$0xff]  ;;  %v563_v21 = vld [vmem:[#allocation7 + $0x8] sm:$0xff] }
  0x54   :  { %1400 = vmatprep.subr.mxu1 %v1659_v0  ;;  %1429 = vmatprep.subr.mxu0 %v1659_v0  ;;  %v562_v22 = vld [vmem:[#allocation7] sm:$0xff]  ;;  %v656_v23 = vld [vmem:[#allocation7 + $0x2f0] sm:$0xff]  ;;  %v655_v24 = vld [vmem:[#allocation7 + $0x2e8] sm:$0xff] }
  0x55   :  { %1401 = vmatpush3.msra.mxu1 %v201_v15  ;;  %1430 = vmatpush3.msra.mxu0 %v298_v28  ;;  %v572_v15 = vld [vmem:[#allocation7 + $0x50] sm:$0xff]  ;;  %v653_v25 = vld [vmem:[#allocation7 + $0x2d8] sm:$0xff]  ;;  %v650_v27 = vld [vmem:[#allocation7 + $0x2c0] sm:$0xff] }
  0x56   :  { %1402 = vmatprep.subr.mxu1 %v1659_v0  ;;  %1431 = vmatprep.subr.mxu0 %v1659_v0  ;;  %v652_v26 = vld [vmem:[#allocation7 + $0x2d0] sm:$0xff]  ;;  %v649_v28 = vld [vmem:[#allocation7 + $0x2b8] sm:$0xff] }
  0x57   :  { %1403 = vmatpush3.msra.mxu1 %v200_v16  ;;  %1432 = vmatpush3.msra.mxu0 %v297_v29  ;;  %v571_v16 = vld [vmem:[#allocation7 + $0x48] sm:$0xff] }
  0x58   :  { %1404 = vmatprep.subr.mxu1 %v1659_v0  ;;  %1433 = vmatprep.subr.mxu0 %v1659_v0  ;;  %v647_v29 = vld [vmem:[#allocation7 + $0x2a8] sm:$0xff] }
  0x59   :  { %1405 = vmatpush3.msra.mxu1 %v199_v17  ;;  %1434 = vmatpush3.msra.mxu0 %v296_v30  ;;  %v569_v17 = vld [vmem:[#allocation7 + $0x38] sm:$0xff]  ;;  %v646_v30 = vld [vmem:[#allocation7 + $0x2a0] sm:$0xff] }
  0x5a   :  { %1406 = vmatprep.subr.mxu1 %v1659_v0  ;;  %1435 = vmatprep.subr.mxu0 %v1659_v0 }
  0x5b   :  { %1407 = vmatpush3.msra.mxu1 %v198_v18  ;;  %1436 = vmatpush3.msra.mxu0 %v295_v31  ;;  %v568_v18 = vld [vmem:[#allocation7 + $0x30] sm:$0xff] }
  0x5c   :  { %1408 = vmatprep.subr.mxu1 %v1659_v0  ;;  %1437 = vmatprep.subr.mxu0 %v1659_v0  ;;  %v644_v31 = vld [vmem:[#allocation7 + $0x290] sm:$0xff] }
  0x5d   :  { %1409 = vmatpush3.msra.mxu1 %v197_v19  ;;  %1438 = vmatpush3.msra.mxu0 %v294_v32  ;;  %v566_v19 = vld [vmem:[#allocation7 + $0x20] sm:$0xff]  ;;  %v643_v32 = vld [vmem:[#allocation7 + $0x288] sm:$0xff] }
  0x5e   :  { %1439 = vmatprep.subr.mxu0 %v1659_v0  ;;  %723 = vmatprep.subr.mxu1 %v608_v54  ;;  %v393_v54 = vld [vmem:[#allocation6 + $0x40] sm:$0xff] }
  0x5f   :  { %1440 = vmatpush3.msra.mxu0 %v293_v38  ;;  %v634_v38 = vld [vmem:[#allocation7 + $0x240] sm:$0xff] }
  0x60   :  { %1441 = vmatprep.subr.mxu0 %v1659_v0 }
  0x61   :  { %1442 = vmatpush3.msra.mxu0 %v292_v39  ;;  %v632_v39 = vld [vmem:[#allocation7 + $0x230] sm:$0xff] }
  0x62   :  { %1443 = vmatprep.subr.mxu0 %v1659_v0 }
  0x63   :  { %1444 = vmatpush3.msra.mxu0 %v291_v40  ;;  %v631_v40 = vld [vmem:[#allocation7 + $0x228] sm:$0xff] }
  0x64   :  { %442 = vmatprep.subr.mxu0 %v395_v41  ;;  %v629_v41 = vld [vmem:[#allocation7 + $0x218] sm:$0xff] }
 0x102   :  { %v192_v34 = vpop.f32.mrf.mxu0 }
 0x103   :  { %v193_v35 = vadd.f32 %v1217_v33, %v192_v34  ;;  %v641_v33 = vld [vmem:[#allocation7 + $0x278] sm:$0xff]  ;;  %v640_v34 = vld [vmem:[#allocation7 + $0x270] sm:$0xff] }
 0x104   :  { %v1377_v36 = vpop.f32.mrf.mxu0 }
 0x105   :  { %v196_v37 = vmax.f32 %v193_v35, 0.0  ;;  %v638_v35 = vld [vmem:[#allocation7 + $0x260] sm:$0xff]  ;;  %v637_v36 = vld [vmem:[#allocation7 + $0x258] sm:$0xff] }
 0x107   :  { %1411 = vmatmul.mubr.f32.vlgmr.msra.gmra.mxu1 %v196_v37  ;;  %v635_v37 = vld [vmem:[#allocation7 + $0x248] sm:$0xff] }
 0x108   :  { %724 = vmatpush1.msra.mxu1 %v607_v55  ;;  %v390_v55 = vld [vmem:[#allocation6 + $0x28] sm:$0xff] }
 0x109   :  { %725 = vmatprep.subr.mxu1 %v605_v56  ;;  %v387_v56 = vld [vmem:[#allocation6 + $0x10] sm:$0xff] }
 0x10a   :  { %726 = vmatpush1.msra.mxu1 %v604_v57  ;;  %v704_v57 = vld [vmem:[#allocation7 + $0x470] sm:$0xff] }
 0x10b   :  { %727 = vmatprep.subr.mxu1 %v602_v58  ;;  %v703_v58 = vld [vmem:[#allocation7 + $0x468] sm:$0xff] }
 0x10c   :  { %728 = vmatpush1.msra.mxu1 %v601_v59  ;;  %v701_v59 = vld [vmem:[#allocation7 + $0x458] sm:$0xff] }
 0x10d   :  { %729 = vmatprep.subr.mxu1 %v599_v60  ;;  %v700_v60 = vld [vmem:[#allocation7 + $0x450] sm:$0xff] }
 0x10e   :  { %730 = vmatpush1.msra.mxu1 %v598_v61  ;;  %v698_v61 = vld [vmem:[#allocation7 + $0x440] sm:$0xff] }
 0x10f   :  { %731 = vmatprep.subr.mxu1 %v596_v62  ;;  %v697_v62 = vld [vmem:[#allocation7 + $0x438] sm:$0xff] }
 0x110   :  { %732 = vmatpush1.msra.mxu1 %v595_v63  ;;  %v695_v63 = vld [vmem:[#allocation7 + $0x428] sm:$0xff] }
 0x111   :  { %733 = vmatprep.subr.mxu1 %v593_v1  ;;  %v694_v1 = vld [vmem:[#allocation7 + $0x420] sm:$0xff] }
 0x112   :  { %734 = vmatpush1.msra.mxu1 %v592_v2  ;;  %v692_v2 = vld [vmem:[#allocation7 + $0x410] sm:$0xff] }
 0x113   :  { %735 = vmatprep.subr.mxu1 %v590_v3  ;;  %v691_v3 = vld [vmem:[#allocation7 + $0x408] sm:$0xff] }
 0x114   :  { %736 = vmatpush1.msra.mxu1 %v589_v4  ;;  %v689_v4 = vld [vmem:[#allocation7 + $0x3f8] sm:$0xff] }
 0x115   :  { %737 = vmatprep.subr.mxu1 %v587_v5  ;;  %v688_v5 = vld [vmem:[#allocation7 + $0x3f0] sm:$0xff] }
 0x116   :  { %738 = vmatpush1.msra.mxu1 %v586_v6  ;;  %v686_v6 = vld [vmem:[#allocation7 + $0x3e0] sm:$0xff] }
 0x117   :  { %739 = vmatprep.subr.mxu1 %v584_v7  ;;  %v685_v7 = vld [vmem:[#allocation7 + $0x3d8] sm:$0xff] }
 0x118   :  { %740 = vmatpush1.msra.mxu1 %v583_v8  ;;  %v683_v8 = vld [vmem:[#allocation7 + $0x3c8] sm:$0xff] }
 0x119   :  { %741 = vmatprep.subr.mxu1 %v581_v9  ;;  %v682_v9 = vld [vmem:[#allocation7 + $0x3c0] sm:$0xff] }
 0x11a   :  { %742 = vmatpush1.msra.mxu1 %v580_v10  ;;  %v680_v10 = vld [vmem:[#allocation7 + $0x3b0] sm:$0xff] }
 0x11b   :  { %743 = vmatprep.subr.mxu1 %v578_v11  ;;  %v679_v11 = vld [vmem:[#allocation7 + $0x3a8] sm:$0xff] }
 0x11c   :  { %744 = vmatpush1.msra.mxu1 %v577_v12  ;;  %v677_v12 = vld [vmem:[#allocation7 + $0x398] sm:$0xff] }
 0x11d   :  { %745 = vmatprep.subr.mxu1 %v575_v13  ;;  %v676_v13 = vld [vmem:[#allocation7 + $0x390] sm:$0xff] }
 0x11e   :  { %746 = vmatpush1.msra.mxu1 %v574_v14  ;;  %v674_v14 = vld [vmem:[#allocation7 + $0x380] sm:$0xff] }
 0x11f   :  { %747 = vmatprep.subr.mxu1 %v572_v15  ;;  %v619_v15 = vld [vmem:[#allocation7 + $0x1c8] sm:$0xff] }
 0x120   :  { %748 = vmatpush1.msra.mxu1 %v571_v16  ;;  %v673_v16 = vld [vmem:[#allocation7 + $0x378] sm:$0xff] }
 0x121   :  { %749 = vmatprep.subr.mxu1 %v569_v17  ;;  %v617_v17 = vld [vmem:[#allocation7 + $0x1b8] sm:$0xff] }
 0x122   :  { %750 = vmatpush1.msra.mxu1 %v568_v18  ;;  %v671_v18 = vld [vmem:[#allocation7 + $0x368] sm:$0xff] }
 0x123   :  { %751 = vmatprep.subr.mxu1 %v566_v19  ;;  %v616_v19 = vld [vmem:[#allocation7 + $0x1b0] sm:$0xff] }
 0x124   :  { %752 = vmatpush1.msra.mxu1 %v565_v20  ;;  %v670_v20 = vld [vmem:[#allocation7 + $0x360] sm:$0xff] }
 0x125   :  { %753 = vmatprep.subr.mxu1 %v563_v21  ;;  %v614_v21 = vld [vmem:[#allocation7 + $0x1a0] sm:$0xff] }
 0x126   :  { %754 = vmatpush1.msra.mxu1 %v562_v22  ;;  %v668_v22 = vld [vmem:[#allocation7 + $0x350] sm:$0xff] }
 0x127   :  { %755 = vmatprep.subr.mxu1 %v656_v23  ;;  %v613_v23 = vld [vmem:[#allocation7 + $0x198] sm:$0xff] }
 0x128   :  { %756 = vmatpush2.msra.mxu1 %v655_v24  ;;  %v667_v24 = vld [vmem:[#allocation7 + $0x348] sm:$0xff] }
 0x129   :  { %757 = vmatprep.subr.mxu1 %v653_v25  ;;  %v611_v25 = vld [vmem:[#allocation7 + $0x188] sm:$0xff] }
 0x12a   :  { %758 = vmatpush2.msra.mxu1 %v652_v26  ;;  %v665_v26 = vld [vmem:[#allocation7 + $0x338] sm:$0xff] }
 0x12b   :  { %759 = vmatprep.subr.mxu1 %v650_v27  ;;  %v610_v27 = vld [vmem:[#allocation7 + $0x180] sm:$0xff] }
 0x12c   :  { %760 = vmatpush2.msra.mxu1 %v649_v28  ;;  %v664_v28 = vld [vmem:[#allocation7 + $0x330] sm:$0xff] }
 0x12d   :  { %761 = vmatprep.subr.mxu1 %v647_v29  ;;  %v662_v29 = vld [vmem:[#allocation7 + $0x320] sm:$0xff] }
 0x12e   :  { %762 = vmatpush2.msra.mxu1 %v646_v30  ;;  %v661_v30 = vld [vmem:[#allocation7 + $0x318] sm:$0xff] }
 0x12f   :  { %763 = vmatprep.subr.mxu1 %v644_v31  ;;  %v659_v31 = vld [vmem:[#allocation7 + $0x308] sm:$0xff] }
 0x130   :  { %764 = vmatpush2.msra.mxu1 %v643_v32  ;;  %v658_v32 = vld [vmem:[#allocation7 + $0x300] sm:$0xff] }
 0x131   :  { %765 = vmatprep.subr.mxu1 %v641_v33  ;;  %v657_v33 = vld [vmem:[#allocation7 + $0x2f8] sm:$0xff] }
 0x132   :  { %766 = vmatpush2.msra.mxu1 %v640_v34  ;;  %v399_v34 = vlaneseq }
 0x133   :  { %767 = vmatprep.subr.mxu1 %v638_v35 }
 0x134   :  { %768 = vmatpush2.msra.mxu1 %v637_v36  ;;  %v1824_v35 = vshrl.u32 %v399_v34, 7  ;;  %v567_v34 = vld [vmem:[#allocation7 + $0x28] sm:$0xff] }
 0x135   :  { %769 = vmatprep.subr.mxu1 %v635_v37  ;;  %v397_v37 = vld [vmem:[%s1910_s8] sm:$0x7] }
 0x136   :  { %770 = vmatpush2.msra.mxu1 %v634_v38  ;;  %v401_v36 = vsub.s32 0, %v1824_v35  ;;  %v405_v38 = vsub.s32 1, %v1824_v35 }
 0x137   :  { %771 = vmatprep.subr.mxu1 %v632_v39 }
 0x138   :  { %772 = vmatpush2.msra.mxu1 %v631_v40  ;;  %v402_v39 = vrot.slane %v397_v37, %v401_v36  ;;  %v406_v40 = vrot.slane %v397_v37, %v405_v38 }
 0x139   :  { %773 = vmatprep.subr.mxu1 %v629_v41 }
 0x1c7   :  { %v286_v43 = vpop.f32.mrf.mxu1 }
 0x1c8   :  { %v287_v44 = vadd.f32 %v1219_v42, %v286_v43  ;;  %v628_v42 = vld [vmem:[#allocation7 + $0x210] sm:$0xff]  ;;  %v626_v43 = vld [vmem:[#allocation7 + $0x200] sm:$0xff] }
 0x1c9   :  { %v1412_v45 = vpop.f32.mrf.mxu1  ;;  %774 = vmatpush2.msra.mxu1 %v628_v42  ;;  %v409_v42 = vsub.s32 2, %v1824_v35 }
 0x1ca   :  { %v290_v46 = vmax.f32 %v287_v44, 0.0  ;;  %v625_v44 = vld [vmem:[#allocation7 + $0x1f8] sm:$0xff]  ;;  %v623_v45 = vld [vmem:[#allocation7 + $0x1e8] sm:$0xff]  ;;  %775 = vmatprep.subr.mxu1 %v626_v43 }
 0x1cb   :  { %776 = vmatpush2.msra.mxu1 %v625_v44 }
 0x1cc   :  { %1446 = vmatmul.mubr.f32.vlgmr.msra.gmra.mxu0 %v290_v46  ;;  %v622_v46 = vld [vmem:[#allocation7 + $0x1e0] sm:$0xff]  ;;  %777 = vmatprep.subr.mxu1 %v623_v45 }
 0x1cd   :  { %443 = vmatpush1.msra.mxu0 %v394_v47  ;;  %482 = vmatprep.mubr.f32.mxu0 %v1659_v0  ;;  %v620_v47 = vld [vmem:[#allocation7 + $0x1d0] sm:$0xff] }
 0x1ce   :  { %444 = vmatprep.subr.mxu0 %v392_v48  ;;  %778 = vmatpush2.msra.mxu1 %v622_v46  ;;  %v1220_v48 = vld [vmem:[%s1908_s6] ss:$0 sm:$0xff] }
 0x1cf   :  { %445 = vmatpush1.msra.mxu0 %v391_v49  ;;  %779 = vmatprep.subr.mxu1 %v620_v47  ;;  %v410_v47 = vrot.slane %v397_v37, %v409_v42  ;;  %v612_v37 = vld [vmem:[#allocation7 + $0x190] sm:$0xff] }
 0x1d0   :  { %446 = vmatprep.subr.mxu0 %v389_v50  ;;  %780 = vmatpush2.msra.mxu1 %v619_v15  ;;  %v633_v15 = vld [vmem:[#allocation7 + $0x238] sm:$0xff] }
 0x1d1   :  { %447 = vmatpush1.msra.mxu0 %v388_v51  ;;  %781 = vmatprep.subr.mxu1 %v617_v17  ;;  %v675_v17 = vld [vmem:[#allocation7 + $0x388] sm:$0xff] }
 0x1d2   :  { %448 = vmatprep.subr.mxu0 %v386_v52  ;;  %782 = vmatpush2.msra.mxu1 %v616_v19  ;;  %v582_v19 = vld [vmem:[#allocation7 + $0xa0] sm:$0xff] }
 0x1d3   :  { %449 = vmatpush1.msra.mxu0 %v385_v53  ;;  %v396_v53 = vld [vmem:[#allocation6 + $0x58] sm:$0xff]  ;;  %783 = vmatprep.subr.mxu1 %v614_v21  ;;  %v627_v21 = vld [vmem:[#allocation7 + $0x208] sm:$0xff] }
 0x1d4   :  { %1448 = vmatprep.subr.mxu0 %v1659_v0  ;;  %784 = vmatpush2.msra.mxu1 %v613_v23  ;;  %v669_v23 = vld [vmem:[#allocation7 + $0x358] sm:$0xff] }
 0x1d5   :  { %785 = vmatprep.subr.mxu1 %v611_v25  ;;  %v576_v25 = vld [vmem:[#allocation7 + $0x70] sm:$0xff] }
 0x1d6   :  { %786 = vmatpush2.msra.mxu1 %v610_v27  ;;  %v621_v27 = vld [vmem:[#allocation7 + $0x1d8] sm:$0xff] }
 0x1d7   :  { %1459 = vmatprep.subr.mxu1 %v1659_v0 }
 0x28c   :  { %v380_v49 = vpop.f32.mrf.mxu0 }
 0x28d   :  { %v381_v50 = vadd.f32 %v1220_v48, %v380_v49  ;;  %v705_v49 = vld [vmem:[#allocation7 + $0x478] sm:$0xff] }
 0x28e   :  { %v1447_v51 = vpop.f32.mrf.mxu0 }
 0x28f   :  { %v384_v52 = vmax.f32 %v381_v50, 0.0  ;;  %v702_v51 = vld [vmem:[#allocation7 + $0x460] sm:$0xff] }
 0x291   :  { %1221 = vmatmul.mubr.msk.f32.vlgmr.msra.gmra.mxu0 %vm414_vm2, %v384_v52 }
 0x292   :  { %1449 = vmatpush3.msra.mxu0 %v396_v53  ;;  %1456 = vmatprep.mubr.msk.f32.mxu0 %vm1660_vm0, %v1659_v0 }
 0x293   :  { %1450 = vmatprep.subr.mxu0 %v1659_v0 }
 0x294   :  { %1451 = vmatpush3.msra.mxu0 %v393_v54  ;;  %v699_v54 = vld [vmem:[#allocation7 + $0x448] sm:$0xff] }
 0x295   :  { %1452 = vmatprep.subr.mxu0 %v1659_v0 }
 0x296   :  { %1453 = vmatpush3.msra.mxu0 %v390_v55 }
 0x297   :  { %1454 = vmatprep.subr.mxu0 %v1659_v0 }
 0x298   :  { %1455 = vmatpush3.msra.mxu0 %v387_v56  ;;  %v609_v56 = vld [vmem:[#allocation7 + $0x178] sm:$0xff] }
 0x299   :  { %1457 = vmatmul.mubr.msk.f32.vlgmr.msra.gmra.mxu0 %vm414_vm2, %v384_v52  ;;  %794 = vmatprep.subr.mxu0 %v704_v57  ;;  %v654_v57 = vld [vmem:[#allocation7 + $0x2e0] sm:$0xff] }
 0x29a   :  { %795 = vmatpush1.msra.mxu0 %v703_v58  ;;  %858 = vmatprep.mubr.f32.mxu0 %v1659_v0  ;;  %v606_v58 = vld [vmem:[#allocation7 + $0x160] sm:$0xff] }
 0x29b   :  { %796 = vmatprep.subr.mxu0 %v701_v59  ;;  %v696_v59 = vld [vmem:[#allocation7 + $0x430] sm:$0xff] }
 0x29c   :  { %797 = vmatpush1.msra.mxu0 %v700_v60  ;;  %v651_v60 = vld [vmem:[#allocation7 + $0x2c8] sm:$0xff] }
 0x29d   :  { %798 = vmatprep.subr.mxu0 %v698_v61  ;;  %v603_v61 = vld [vmem:[#allocation7 + $0x148] sm:$0xff] }
 0x29e   :  { %799 = vmatpush1.msra.mxu0 %v697_v62  ;;  %v693_v62 = vld [vmem:[#allocation7 + $0x418] sm:$0xff] }
 0x29f   :  { %800 = vmatprep.subr.mxu0 %v695_v63  ;;  %v648_v63 = vld [vmem:[#allocation7 + $0x2b0] sm:$0xff] }
 0x2a0   :  { %801 = vmatpush1.msra.mxu0 %v694_v1  ;;  %v600_v1 = vld [vmem:[#allocation7 + $0x130] sm:$0xff] }
 0x2a1   :  { %802 = vmatprep.subr.mxu0 %v692_v2  ;;  %v690_v2 = vld [vmem:[#allocation7 + $0x400] sm:$0xff] }
 0x2a2   :  { %803 = vmatpush1.msra.mxu0 %v691_v3  ;;  %v645_v3 = vld [vmem:[#allocation7 + $0x298] sm:$0xff] }
 0x2a3   :  { %804 = vmatprep.subr.mxu0 %v689_v4  ;;  %v597_v4 = vld [vmem:[#allocation7 + $0x118] sm:$0xff] }
 0x2a4   :  { %805 = vmatpush1.msra.mxu0 %v688_v5  ;;  %v687_v5 = vld [vmem:[#allocation7 + $0x3e8] sm:$0xff] }
 0x2a5   :  { %806 = vmatprep.subr.mxu0 %v686_v6  ;;  %v642_v6 = vld [vmem:[#allocation7 + $0x280] sm:$0xff] }
 0x2a6   :  { %807 = vmatpush1.msra.mxu0 %v685_v7  ;;  %v594_v7 = vld [vmem:[#allocation7 + $0x100] sm:$0xff] }
 0x2a7   :  { %808 = vmatprep.subr.mxu0 %v683_v8  ;;  %v684_v8 = vld [vmem:[#allocation7 + $0x3d0] sm:$0xff] }
 0x2a8   :  { %809 = vmatpush1.msra.mxu0 %v682_v9  ;;  %v639_v9 = vld [vmem:[#allocation7 + $0x268] sm:$0xff] }
 0x2a9   :  { %810 = vmatprep.subr.mxu0 %v680_v10  ;;  %v591_v10 = vld [vmem:[#allocation7 + $0xe8] sm:$0xff] }
 0x2aa   :  { %811 = vmatpush1.msra.mxu0 %v679_v11  ;;  %v681_v11 = vld [vmem:[#allocation7 + $0x3b8] sm:$0xff] }
 0x2ab   :  { %812 = vmatprep.subr.mxu0 %v677_v12  ;;  %v636_v12 = vld [vmem:[#allocation7 + $0x250] sm:$0xff] }
 0x2ac   :  { %813 = vmatpush1.msra.mxu0 %v676_v13  ;;  %v588_v13 = vld [vmem:[#allocation7 + $0xd0] sm:$0xff] }
 0x2ad   :  { %814 = vmatprep.subr.mxu0 %v674_v14  ;;  %v678_v14 = vld [vmem:[#allocation7 + $0x3a0] sm:$0xff] }
 0x2ae   :  { %815 = vmatpush1.msra.mxu0 %v673_v16  ;;  %v585_v16 = vld [vmem:[#allocation7 + $0xb8] sm:$0xff] }
 0x2af   :  { %816 = vmatprep.subr.mxu0 %v671_v18  ;;  %v630_v18 = vld [vmem:[#allocation7 + $0x220] sm:$0xff] }
 0x2b0   :  { %817 = vmatpush1.msra.mxu0 %v670_v20  ;;  %v672_v20 = vld [vmem:[#allocation7 + $0x370] sm:$0xff] }
 0x2b1   :  { %818 = vmatprep.subr.mxu0 %v668_v22  ;;  %v579_v22 = vld [vmem:[#allocation7 + $0x88] sm:$0xff] }
 0x2b2   :  { %819 = vmatpush1.msra.mxu0 %v667_v24  ;;  %v624_v24 = vld [vmem:[#allocation7 + $0x1f0] sm:$0xff] }
 0x2b3   :  { %820 = vmatprep.subr.mxu0 %v665_v26  ;;  %v666_v26 = vld [vmem:[#allocation7 + $0x340] sm:$0xff] }
 0x2b4   :  { %821 = vmatpush1.msra.mxu0 %v664_v28  ;;  %v573_v28 = vld [vmem:[#allocation7 + $0x58] sm:$0xff] }
 0x2b5   :  { %822 = vmatprep.subr.mxu0 %v662_v29  ;;  %v663_v29 = vld [vmem:[#allocation7 + $0x328] sm:$0xff] }
 0x2b6   :  { %823 = vmatpush1.msra.mxu0 %v661_v30  ;;  %v618_v30 = vld [vmem:[#allocation7 + $0x1c0] sm:$0xff] }
 0x2b7   :  { %824 = vmatprep.subr.mxu0 %v659_v31  ;;  %v570_v31 = vld [vmem:[#allocation7 + $0x40] sm:$0xff] }
 0x2b8   :  { %825 = vmatpush1.msra.mxu0 %v658_v32  ;;  %v660_v32 = vld [vmem:[#allocation7 + $0x310] sm:$0xff] }
 0x2b9   :  { %1267 = vmatprep.subr.mxu0 %v657_v33  ;;  %v615_v33 = vld [vmem:[#allocation7 + $0x1a8] sm:$0xff] }
 0x351   :  { %v484_v41 = vpop.f32.mrf.mxu0 }
 0x352   :  { %v1836_v43 = vadd.f32 %v484_v41, %v402_v39  ;;  %v564_v39 = vld [vmem:[#allocation7 + $0x10] sm:$0xff]  ;;  %v1023_v41 = vld [vmem:[#allocation9 + $0x78] sm:$0xff] }
 0x353   :  { %v486_v44 = vpop.f32.mrf.mxu0 }
 0x354   :  { %v487_v45 = vadd.f32 %v486_v44, %v406_v40  ;;  %v559_v48 = vmax.f32 %v1836_v43, 0.0  ;;  %v1039_v40 = vld [vmem:[#allocation9 + $0xf8] sm:$0xff]  ;;  %v1038_v44 = vld [vmem:[#allocation9 + $0xf0] sm:$0xff]  ;;  %v1033_v43 = vld [vmem:[#allocation9 + $0xc8] sm:$0xff] }
 0x356   :  { %v560_v46 = vmax.f32 %v487_v45, 0.0  ;;  %v1022_v45 = vld [vmem:[#allocation9 + $0x70] sm:$0xff] }
 0x358   :  { %787 = vmatprep.mubr.f32.mxu1 %v560_v46 }
 0x359   :  { %v555_v50 = vpop.f32.mrf.mxu0  ;;  %788 = vmatmul.mubr.f32.vlgmr.msra.gmra.mxu1 %v559_v48 }
 0x35a   :  { %v1843_v52 = vadd.f32 %v555_v50, %v410_v47  ;;  %1460 = vmatpush3.msra.mxu1 %v705_v49  ;;  %1491 = vmatprep.mubr.msk.f32.mxu1 %vm1660_vm0, %v1659_v0  ;;  %v1021_v47 = vld [vmem:[#allocation9 + $0x68] sm:$0xff]  ;;  %v1036_v49 = vld [vmem:[#allocation9 + $0xe0] sm:$0xff] }
 0x35b   :  { %v1458_v53 = vpop.f32.mrf.mxu0  ;;  %1461 = vmatprep.subr.mxu1 %v1659_v0  ;;  %v1020_v50 = vld [vmem:[#allocation9 + $0x60] sm:$0xff] }
 0x35c   :  { %v561_v55 = vmax.f32 %v1843_v52, 0.0  ;;  %1462 = vmatpush3.msra.mxu1 %v702_v51  ;;  %v1035_v51 = vld [vmem:[#allocation9 + $0xd8] sm:$0xff]  ;;  %v1034_v53 = vld [vmem:[#allocation9 + $0xd0] sm:$0xff] }
 0x35d   :  { %1463 = vmatprep.subr.mxu1 %v1659_v0  ;;  %v1019_v52 = vld [vmem:[#allocation9 + $0x58] sm:$0xff] }
 0x35e   :  { %859 = vmatmul.mubr.f32.vlgmr.msra.gmra.mxu0 %v561_v55  ;;  %1464 = vmatpush3.msra.mxu1 %v699_v54  ;;  %v1018_v54 = vld [vmem:[#allocation9 + $0x50] sm:$0xff] }
 0x35f   :  { %1268 = vmatpush3.msra.mxu0 %v609_v56  ;;  %929 = vmatprep.mubr.f32.mxu0 %v560_v46  ;;  %v1037_v46 = vld [vmem:[#allocation9 + $0xe8] sm:$0xff]  ;;  %v1016_v56 = vld [vmem:[#allocation9 + $0x40] sm:$0xff] }
 0x360   :  { %1269 = vmatprep.subr.mxu0 %v654_v57  ;;  %1465 = vmatprep.subr.mxu1 %v1659_v0  ;;  %v1031_v57 = vld [vmem:[#allocation9 + $0xb8] sm:$0xff] }
 0x361   :  { %1270 = vmatpush3.msra.mxu0 %v606_v58  ;;  %1466 = vmatpush3.msra.mxu1 %v696_v59  ;;  %v1015_v58 = vld [vmem:[#allocation9 + $0x38] sm:$0xff]  ;;  %v1030_v59 = vld [vmem:[#allocation9 + $0xb0] sm:$0xff] }
 0x362   :  { %1271 = vmatprep.subr.mxu0 %v651_v60  ;;  %1467 = vmatprep.subr.mxu1 %v1659_v0  ;;  %v1014_v60 = vld [vmem:[#allocation9 + $0x30] sm:$0xff] }
 0x363   :  { %1272 = vmatpush3.msra.mxu0 %v603_v61  ;;  %1468 = vmatpush3.msra.mxu1 %v693_v62  ;;  %v1029_v61 = vld [vmem:[#allocation9 + $0xa8] sm:$0xff] }
 0x364   :  { %1273 = vmatprep.subr.mxu0 %v648_v63  ;;  %1469 = vmatprep.subr.mxu1 %v1659_v0  ;;  %v1013_v62 = vld [vmem:[#allocation9 + $0x28] sm:$0xff]  ;;  %v1028_v63 = vld [vmem:[#allocation9 + $0xa0] sm:$0xff] }
 0x365   :  { %1274 = vmatpush3.msra.mxu0 %v600_v1  ;;  %1470 = vmatpush3.msra.mxu1 %v690_v2  ;;  %v1012_v1 = vld [vmem:[#allocation9 + $0x20] sm:$0xff]  ;;  %v1027_v2 = vld [vmem:[#allocation9 + $0x98] sm:$0xff] }
 0x366   :  { %1275 = vmatprep.subr.mxu0 %v645_v3  ;;  %1471 = vmatprep.subr.mxu1 %v1659_v0  ;;  %v1011_v3 = vld [vmem:[#allocation9 + $0x18] sm:$0xff] }
 0x367   :  { %1276 = vmatpush3.msra.mxu0 %v597_v4  ;;  %1472 = vmatpush3.msra.mxu1 %v687_v5  ;;  %v1026_v4 = vld [vmem:[#allocation9 + $0x90] sm:$0xff] }
 0x368   :  { %1277 = vmatprep.subr.mxu0 %v642_v6  ;;  %1473 = vmatprep.subr.mxu1 %v1659_v0  ;;  %v1010_v5 = vld [vmem:[#allocation9 + $0x10] sm:$0xff]  ;;  %v1025_v6 = vld [vmem:[#allocation9 + $0x88] sm:$0xff] }
 0x369   :  { %1278 = vmatpush3.msra.mxu0 %v594_v7  ;;  %1474 = vmatpush3.msra.mxu1 %v684_v8  ;;  %v1009_v7 = vld [vmem:[#allocation9 + $0x8] sm:$0xff]  ;;  %v1024_v8 = vld [vmem:[#allocation9 + $0x80] sm:$0xff] }
 0x36a   :  { %1279 = vmatprep.subr.mxu0 %v639_v9  ;;  %1475 = vmatprep.subr.mxu1 %v1659_v0  ;;  %v1008_v9 = vld [vmem:[#allocation9] sm:$0xff] }
 0x36b   :  { %1280 = vmatpush3.msra.mxu0 %v591_v10  ;;  %1476 = vmatpush3.msra.mxu1 %v681_v11  ;;  %v1055_v10 = vld [vmem:[#allocation9 + $0x178] sm:$0xff]  ;;  %v1054_v11 = vld [vmem:[#allocation9 + $0x170] sm:$0xff] }
 0x36c   :  { %1281 = vmatprep.subr.mxu0 %v636_v12  ;;  %1477 = vmatprep.subr.mxu1 %v1659_v0  ;;  %v1053_v12 = vld [vmem:[#allocation9 + $0x168] sm:$0xff] }
 0x36d   :  { %1282 = vmatpush3.msra.mxu0 %v588_v13  ;;  %1478 = vmatpush3.msra.mxu1 %v678_v14  ;;  %v1052_v13 = vld [vmem:[#allocation9 + $0x160] sm:$0xff]  ;;  %v1051_v14 = vld [vmem:[#allocation9 + $0x158] sm:$0xff] }
 0x36e   :  { %1283 = vmatprep.subr.mxu0 %v633_v15  ;;  %1479 = vmatprep.subr.mxu1 %v1659_v0  ;;  %v1050_v15 = vld [vmem:[#allocation9 + $0x150] sm:$0xff] }
 0x36f   :  { %1284 = vmatpush3.msra.mxu0 %v585_v16  ;;  %1480 = vmatpush3.msra.mxu1 %v675_v17  ;;  %v1049_v16 = vld [vmem:[#allocation9 + $0x148] sm:$0xff]  ;;  %v1048_v17 = vld [vmem:[#allocation9 + $0x140] sm:$0xff] }
 0x370   :  { %1285 = vmatprep.subr.mxu0 %v630_v18  ;;  %1481 = vmatprep.subr.mxu1 %v1659_v0  ;;  %v1047_v18 = vld [vmem:[#allocation9 + $0x138] sm:$0xff] }
 0x371   :  { %1286 = vmatpush3.msra.mxu0 %v582_v19  ;;  %1482 = vmatpush3.msra.mxu1 %v672_v20  ;;  %v1046_v19 = vld [vmem:[#allocation9 + $0x130] sm:$0xff]  ;;  %v1045_v20 = vld [vmem:[#allocation9 + $0x128] sm:$0xff] }
 0x372   :  { %1287 = vmatprep.subr.mxu0 %v627_v21  ;;  %1483 = vmatprep.subr.mxu1 %v1659_v0  ;;  %v1044_v21 = vld [vmem:[#allocation9 + $0x120] sm:$0xff] }
 0x373   :  { %1288 = vmatpush3.msra.mxu0 %v579_v22  ;;  %1484 = vmatpush3.msra.mxu1 %v669_v23  ;;  %v1043_v22 = vld [vmem:[#allocation9 + $0x118] sm:$0xff]  ;;  %v1042_v23 = vld [vmem:[#allocation9 + $0x110] sm:$0xff] }
 0x374   :  { %1289 = vmatprep.subr.mxu0 %v624_v24  ;;  %1485 = vmatprep.subr.mxu1 %v1659_v0  ;;  %v1041_v24 = vld [vmem:[#allocation9 + $0x108] sm:$0xff] }
 0x375   :  { %1290 = vmatpush3.msra.mxu0 %v576_v25  ;;  %1486 = vmatpush3.msra.mxu1 %v666_v26  ;;  %v1040_v25 = vld [vmem:[#allocation9 + $0x100] sm:$0xff] }
 0x376   :  { %1291 = vmatprep.subr.mxu0 %v621_v27  ;;  %1487 = vmatprep.subr.mxu1 %v1659_v0  ;;  %v706_v26 = vld [vmem:[%s1912_s10] sm:$0x7] }
 0x377   :  { %1292 = vmatpush3.msra.mxu0 %v573_v28  ;;  %1488 = vmatpush3.msra.mxu1 %v663_v29  ;;  %v711_v28 = vrot.slane %v706_v26, %v401_v36  ;;  %v715_v29 = vrot.slane %v706_v26, %v405_v38  ;;  %v719_v36 = vrot.slane %v706_v26, %v409_v42 }
 0x378   :  { %1293 = vmatprep.subr.mxu0 %v618_v30  ;;  %1489 = vmatprep.subr.mxu1 %v1659_v0 }
 0x379   :  { %1294 = vmatpush3.msra.mxu0 %v570_v31  ;;  %1490 = vmatpush3.msra.mxu1 %v660_v32 }
 0x37a   :  { %1295 = vmatprep.subr.mxu0 %v615_v33  ;;  %1492 = vmatmul.mubr.f32.vlgmr.msra.gmra.mxu1 %v561_v55  ;;  %v1032_v55 = vld [vmem:[#allocation9 + $0xc0] sm:$0xff] }
 0x37b   :  { %1296 = vmatpush3.msra.mxu0 %v567_v34  ;;  %1494 = vmatprep.subr.mxu1 %v1659_v0 }
 0x37c   :  { %1297 = vmatprep.subr.mxu0 %v612_v37  ;;  %1526 = vmatprep.mubr.msk.f32.mxu1 %vm1660_vm0, %v1659_v0 }
 0x37d   :  { %1298 = vmatpush3.msra.mxu0 %v564_v39  ;;  %1495 = vmatpush3.msra.mxu1 %v1055_v10 }
 0x37e   :  { %930 = vmatmul.mubr.f32.vlgmr.msra.gmra.mxu0 %v559_v48  ;;  %1319 = vmatprep.subr.mxu0 %v1039_v40  ;;  %v1017_v48 = vld [vmem:[#allocation9 + $0x48] sm:$0xff] }
 0x37f   :  { %1320 = vmatpush3.msra.mxu0 %v1023_v41  ;;  %1496 = vmatprep.subr.mxu1 %v1659_v0 }
 0x380   :  { %1321 = vmatprep.subr.mxu0 %v1038_v44  ;;  %1497 = vmatpush3.msra.mxu1 %v1054_v11 }
 0x381   :  { %1322 = vmatpush3.msra.mxu0 %v1022_v45  ;;  %1498 = vmatprep.subr.mxu1 %v1659_v0 }
 0x382   :  { %1323 = vmatprep.subr.mxu0 %v1037_v46  ;;  %1499 = vmatpush3.msra.mxu1 %v1053_v12 }
 0x383   :  { %1324 = vmatpush3.msra.mxu0 %v1021_v47  ;;  %1500 = vmatprep.subr.mxu1 %v1659_v0 }
 0x384   :  { %1325 = vmatprep.subr.mxu0 %v1036_v49  ;;  %1501 = vmatpush3.msra.mxu1 %v1052_v13 }
 0x385   :  { %1326 = vmatpush3.msra.mxu0 %v1020_v50  ;;  %1502 = vmatprep.subr.mxu1 %v1659_v0 }
 0x386   :  { %1327 = vmatprep.subr.mxu0 %v1035_v51  ;;  %1503 = vmatpush3.msra.mxu1 %v1051_v14 }
 0x387   :  { %1328 = vmatpush3.msra.mxu0 %v1019_v52  ;;  %1504 = vmatprep.subr.mxu1 %v1659_v0 }
 0x388   :  { %1329 = vmatprep.subr.mxu0 %v1034_v53  ;;  %1505 = vmatpush3.msra.mxu1 %v1050_v15 }
 0x389   :  { %1330 = vmatpush3.msra.mxu0 %v1018_v54  ;;  %1506 = vmatprep.subr.mxu1 %v1659_v0  ;;  %v1223_v54 = vld [vmem:[%s1914_s12] ss:$0 sm:$0xff] }
 0x38a   :  { %1331 = vmatprep.subr.mxu0 %v1033_v43  ;;  %1507 = vmatpush3.msra.mxu1 %v1049_v16 }
 0x38b   :  { %1332 = vmatpush3.msra.mxu0 %v1017_v48  ;;  %1508 = vmatprep.subr.mxu1 %v1659_v0 }
 0x38c   :  { %1333 = vmatprep.subr.mxu0 %v1032_v55  ;;  %1509 = vmatpush3.msra.mxu1 %v1048_v17 }
 0x38d   :  { %1334 = vmatpush3.msra.mxu0 %v1016_v56  ;;  %1510 = vmatprep.subr.mxu1 %v1659_v0 }
 0x38e   :  { %1335 = vmatprep.subr.mxu0 %v1031_v57  ;;  %1511 = vmatpush3.msra.mxu1 %v1047_v18 }
 0x38f   :  { %1336 = vmatpush3.msra.mxu0 %v1015_v58  ;;  %1512 = vmatprep.subr.mxu1 %v1659_v0 }
 0x390   :  { %1337 = vmatprep.subr.mxu0 %v1030_v59  ;;  %1513 = vmatpush3.msra.mxu1 %v1046_v19 }
 0x391   :  { %1338 = vmatpush3.msra.mxu0 %v1014_v60  ;;  %1514 = vmatprep.subr.mxu1 %v1659_v0 }
 0x392   :  { %1339 = vmatprep.subr.mxu0 %v1029_v61  ;;  %1515 = vmatpush3.msra.mxu1 %v1045_v20 }
 0x393   :  { %1340 = vmatpush3.msra.mxu0 %v1013_v62  ;;  %1516 = vmatprep.subr.mxu1 %v1659_v0 }
 0x394   :  { %1341 = vmatprep.subr.mxu0 %v1028_v63  ;;  %1517 = vmatpush3.msra.mxu1 %v1044_v21 }
 0x395   :  { %1342 = vmatpush3.msra.mxu0 %v1012_v1  ;;  %1518 = vmatprep.subr.mxu1 %v1659_v0 }
 0x396   :  { %1343 = vmatprep.subr.mxu0 %v1027_v2  ;;  %1519 = vmatpush3.msra.mxu1 %v1043_v22 }
 0x397   :  { %1344 = vmatpush3.msra.mxu0 %v1011_v3  ;;  %1520 = vmatprep.subr.mxu1 %v1659_v0 }
 0x398   :  { %1345 = vmatprep.subr.mxu0 %v1026_v4  ;;  %1521 = vmatpush3.msra.mxu1 %v1042_v23 }
 0x399   :  { %1346 = vmatpush3.msra.mxu0 %v1010_v5  ;;  %1522 = vmatprep.subr.mxu1 %v1659_v0 }
 0x39a   :  { %1347 = vmatprep.subr.mxu0 %v1025_v6  ;;  %1523 = vmatpush3.msra.mxu1 %v1041_v24 }
 0x39b   :  { %1348 = vmatpush3.msra.mxu0 %v1009_v7  ;;  %1524 = vmatprep.subr.mxu1 %v1659_v0 }
 0x39c   :  { %1349 = vmatprep.subr.mxu0 %v1024_v8  ;;  %1525 = vmatpush3.msra.mxu1 %v1040_v25 }
 0x39d   :  { %1350 = vmatpush3.msra.mxu0 %v1008_v9 }
 0x419   :  { %v789_v27 = vpop.f32.mrf.mxu1 }
 0x41a   :  { %v790_v31 = vadd.f32 %v789_v27, %v711_v28 }
 0x41b   :  { %v791_v30 = vpop.f32.mrf.mxu1 }
 0x41c   :  { %v792_v33 = vadd.f32 %v791_v30, %v715_v29 }
 0x41e   :  { %v860_v32 = vpop.f32.mrf.mxu0 }
 0x41f   :  { %v861_v34 = vadd.f32 %v860_v32, %v790_v31 }
 0x420   :  { %v862_v37 = vpop.f32.mrf.mxu0 }
 0x421   :  { %v863_v0 = vadd.f32 %v862_v37, %v792_v33  ;;  %v1005_v40 = vmax.f32 %v861_v34, 0.0 }
 0x423   :  { %v1006_v39 = vmax.f32 %v863_v0, 0.0 }
 0x425   :  { %1127 = vmatprep.mubr.f32.mxu0 %v1006_v39 }
 0x426   :  { %1128 = vmatmul.mubr.f32.vlgmr.msra.gmra.mxu0 %v1005_v40 }
 0x43a   :  { %v1001_v41 = vpop.f32.mrf.mxu1 }
 0x43c   :  { %v1493_v44 = vpop.f32.mrf.mxu1 }
 0x43e   :  { %v1299_v45 = vpop.f32.mrf.mxu0 }
 0x440   :  { %v1300_v46 = vpop.f32.mrf.mxu0 }
 0x441   :  { %v1301_v47 = vadd.f32 %v1300_v46, %v1299_v45 }
 0x443   :  { %v932_v38 = vadd.f32 %v1301_v47, %v719_v36 }
 0x445   :  { %v1002_v49 = vadd.f32 %v1001_v41, %v932_v38 }
 0x447   :  { %v1007_v50 = vmax.f32 %v1002_v49, 0.0 }
 0x449   :  { %1527 = vmatmul.mubr.f32.vlgmr.msra.gmra.mxu1 %v1007_v50 }
 0x4e6   :  { %v1351_v51 = vpop.f32.mrf.mxu0 }
 0x4e8   :  { %v1352_v52 = vpop.f32.mrf.mxu0 }
 0x4e9   :  { %v1353_v53 = vadd.f32 %v1352_v52, %v1351_v51 }
 0x4eb   :  { %v1130_v43 = vadd.f32 %v1353_v53, %v1223_v54 }
 0x509   :  { %v1199_v48 = vpop.f32.mrf.mxu1 }
 0x50a   :  { %v1200_v55 = vadd.f32 %v1199_v48, %v1130_v43 }
 0x50b   :  { %v1528_v56 = vpop.f32.mrf.mxu1 }
 0x50c   :  { %v1224_v57 = vmul.f32 -1.442695, %v1200_v55 }
 0x50e   :  { %1540 = vpow2.f32 %v1224_v57 }
 0x51b   :  { %v1541_v35 = vpop.eup %1540 }
 0x51c   :  { %v1206_v42 = vadd.f32 1.0, %v1541_v35 }
 0x51e   :  { %1542 = vrcp.f32 %v1206_v42 }
 0x52b   :  { %v1543_v58 = vpop.eup %1542 }
 0x52c   :  { %1209 = vst [vmem:[%s1915_s13] sm:$0xff] %v1543_v58 }
 0x52d   :  { %1214 = vsyncpa [#allocation3], 1 }
 0x52e   :  { %1215 = vsyncpa [#allocation5], 1 }
 0x52f   :  { %1216 = vsyncpa [#allocation8], 1 }

</bundles_post_ra>
